<compile_context>
chip_gen: v6e
topology: v6e:2x2x1
jax: 0.10.0
libtpu: 0.0.40
codegen_flags: <defaults>
</compile_context>

<pallas_src>
import jax
import jax.numpy as jnp
from jax.experimental import pallas as pl
from jax.experimental.pallas import tpu as pltpu


def lstm_seq_kernel(x_ref, h0_ref, c0_ref, wih_ref, whh_ref, b_ref,
                    h_out_ref, c_out_ref, h_sc, c_sc):
    # x_ref:   (1, 1, I)  -- x_t for the current grid step
    # h0_ref:  (1, H)     c0_ref: (1, H)      (initial state, loaded once)
    # wih_ref: (I, 4H)    whh_ref: (H, 4H)    b_ref: (1, 4H)   (VMEM-resident)
    # h_sc/c_sc: (1, H) f32 scratch carrying the recurrent state across steps
    t = pl.program_id(0)

    @pl.when(t == 0)
    def _():
        h_sc[...] = h0_ref[...].astype(jnp.float32)
        c_sc[...] = c0_ref[...].astype(jnp.float32)

    x = x_ref[0].astype(jnp.float32)          # (1, I)
    h = h_sc[...]                             # (1, H), f32
    c = c_sc[...]                             # (1, H), f32

    # Gate pre-activations: (1, 4H). Weights are already transposed so both
    # matmuls are plain row-vector @ (K, 4H) MXU ops with f32 accumulation.
    gates = (jnp.dot(x, wih_ref[...], preferred_element_type=jnp.float32)
             + jnp.dot(h, whh_ref[...], preferred_element_type=jnp.float32)
             + b_ref[...].astype(jnp.float32))

    H = h_out_ref.shape[-1]
    # Two full-vreg EUP passes instead of four sub-slice activations.
    sig = jax.nn.sigmoid(gates)               # covers i, f, o
    tan = jnp.tanh(gates)                     # covers g
    i_g = sig[:, 0 * H:1 * H]
    f_g = sig[:, 1 * H:2 * H]
    g_g = tan[:, 2 * H:3 * H]
    o_g = sig[:, 3 * H:4 * H]

    c_next = f_g * c + i_g * g_g
    h_next = o_g * jnp.tanh(c_next)

    # Carry the state in f32; cast only at the output boundary.
    h_sc[...] = h_next
    c_sc[...] = c_next
    h_out_ref[...] = h_next.astype(h_out_ref.dtype)
    c_out_ref[...] = c_next.astype(c_out_ref.dtype)


def prepare_params(w_ih, w_hh, b_ih, b_hh):
    """One-time parameter prep (hoisted out of the per-step path).

    PyTorch layout in:  w_ih (4H, I), w_hh (4H, H), b_ih/b_hh (4H,).
    Kernel layout out:  W_ih^T (I, 4H), W_hh^T (H, 4H), fused bias (1, 4H).
    """
    H4 = w_ih.shape[0]
    wih_t = w_ih.T
    whh_t = w_hh.T
    b = (b_ih + b_hh).reshape(1, H4)
    return wih_t, whh_t, b


def lstm_sequence(x_seq, h0, c0, params):
    """Run T LSTM steps inside a single pallas_call.

    x_seq: (T, I), h0/c0: (H,). Returns final (h, c), each (H,).
    """
    wih_t, whh_t, b = params
    T, I = x_seq.shape
    H = h0.shape[-1]
    H4 = 4 * H
    out_dtype = x_seq.dtype

    x3 = x_seq.reshape(T, 1, I)   # leading time axis; (1, I) tile per step
    h2 = h0.reshape(1, H)
    c2 = c0.reshape(1, H)

    h_out, c_out = pl.pallas_call(
        lstm_seq_kernel,
        out_shape=(jax.ShapeDtypeStruct((1, H), out_dtype),
                   jax.ShapeDtypeStruct((1, H), out_dtype)),
        grid_spec=pltpu.PrefetchScalarGridSpec(
            num_scalar_prefetch=0,
            grid=(T,),
            in_specs=[
                pl.BlockSpec((1, 1, I), lambda t: (t, 0, 0)),  # x_t: streamed per step
                pl.BlockSpec((1, H), lambda t: (0, 0)),        # h0: loaded once
                pl.BlockSpec((1, H), lambda t: (0, 0)),        # c0: loaded once
                pl.BlockSpec((I, H4), lambda t: (0, 0)),       # W_ih^T: VMEM-resident
                pl.BlockSpec((H, H4), lambda t: (0, 0)),       # W_hh^T: VMEM-resident
                pl.BlockSpec((1, H4), lambda t: (0, 0)),       # fused bias: resident
            ],
            out_specs=(pl.BlockSpec((1, H), lambda t: (0, 0)),
                       pl.BlockSpec((1, H), lambda t: (0, 0))),
            scratch_shapes=[pltpu.VMEM((1, H), jnp.float32),   # h carry (f32)
                            pltpu.VMEM((1, H), jnp.float32)],  # c carry (f32)
        ),
        compiler_params=pltpu.CompilerParams(
            # Time recurrence is inherently sequential.
            dimension_semantics=("arbitrary",)),
    )(x3, h2, c2, wih_t, whh_t, b)

    return h_out.reshape(-1), c_out.reshape(-1)


def lstm_step(x, h_prev, c_prev, params):
    """Equivalent to the PyTorch module's forward: one step (seq_len=1, batch=1)."""
    return lstm_sequence(x.reshape(1, -1), h_prev, c_prev, params)


def _reference_step(x, h_prev, c_prev, w_ih, w_hh, b_ih, b_hh):
    H = h_prev.shape[-1]
    gates = x @ w_ih.T + b_ih + h_prev @ w_hh.T + b_hh
    i = jax.nn.sigmoid(gates[0 * H:1 * H])
    f = jax.nn.sigmoid(gates[1 * H:2 * H])
    g = jnp.tanh(gates[2 * H:3 * H])
    o = jax.nn.sigmoid(gates[3 * H:4 * H])
    c_next = f * c_prev + i * g
    h_next = o * jnp.tanh(c_next)
    return h_next, c_next


if __name__ == "__main__":
    input_size = 16
    hidden_size = 32
    seq_len = 8   # extra sequence check through the same kernel

    key = jax.random.PRNGKey(0)
    kx, kh, kc, k1, k2, k3, k4, kseq = jax.random.split(key, 8)

    # Parameter init mimicking nn.LSTM: U(-1/sqrt(H), 1/sqrt(H)).
    bound = 1.0 / jnp.sqrt(jnp.float32(hidden_size))
    w_ih = jax.random.uniform(k1, (4 * hidden_size, input_size),
                              jnp.float32, -bound, bound)
    w_hh = jax.random.uniform(k2, (4 * hidden_size, hidden_size),
                              jnp.float32, -bound, bound)
    b_ih = jax.random.uniform(k3, (4 * hidden_size,), jnp.float32, -bound, bound)
    b_hh = jax.random.uniform(k4, (4 * hidden_size,), jnp.float32, -bound, bound)

    # Hoisted once: transpose + bias fusion happen outside the step path.
    params = prepare_params(w_ih, w_hh, b_ih, b_hh)

    x = jax.random.normal(kx, (input_size,), jnp.float32)
    h_prev = jax.random.normal(kh, (hidden_size,), jnp.float32)
    c_prev = jax.random.normal(kc, (hidden_size,), jnp.float32)

    # --- Module-equivalent forward: single step ---
    h_next, c_next = lstm_step(x, h_prev, c_prev, params)
    jax.block_until_ready((h_next, c_next))

    h_ref, c_ref = _reference_step(x, h_prev, c_prev, w_ih, w_hh, b_ih, b_hh)
    assert h_next.shape == (hidden_size,) and c_next.shape == (hidden_size,)
    assert jnp.allclose(h_next, h_ref, atol=1e-5)
    assert jnp.allclose(c_next, c_ref, atol=1e-5)

    # --- Same kernel over a T=8 sequence: one pallas_call, weights loaded once,
    #     recurrence carried in VMEM scratch across grid steps. ---
    x_seq = jax.random.normal(kseq, (seq_len, input_size), jnp.float32)
    h_T, c_T = lstm_sequence(x_seq, h_prev, c_prev, params)
    jax.block_until_ready((h_T, c_T))

    h_r, c_r = h_prev, c_prev
    for t in range(seq_len):
        h_r, c_r = _reference_step(x_seq[t], h_r, c_r, w_ih, w_hh, b_ih, b_hh)
    assert jnp.allclose(h_T, h_r, atol=1e-4)
    assert jnp.allclose(c_T, c_r, atol=1e-4)

    print("KERNEL_OK")
</pallas_src>

<mosaic_0001>
module attributes {stable_mosaic.version = 11 : i64} {
  func.func @lstm_seq_kernel(%arg0: i32, %arg1: memref<1x1x16xf32, #tpu.memory_space<vmem>>, %arg2: memref<1x32xf32, #tpu.memory_space<vmem>>, %arg3: memref<1x32xf32, #tpu.memory_space<vmem>>, %arg4: memref<16x128xf32, #tpu.memory_space<vmem>>, %arg5: memref<32x128xf32, #tpu.memory_space<vmem>>, %arg6: memref<1x128xf32, #tpu.memory_space<vmem>>, %arg7: memref<1x32xf32, #tpu.memory_space<vmem>>, %arg8: memref<1x32xf32, #tpu.memory_space<vmem>>, %arg9: memref<1x32xf32, #tpu.memory_space<vmem>>, %arg10: memref<1x32xf32, #tpu.memory_space<vmem>>) attributes {dimension_semantics = [#tpu.dimension_semantics<arbitrary>], iteration_bounds = array<i64: 1>, scalar_prefetch = 0 : i64, scratch_operands = 2 : i64, tpu.core_type = #tpu.core_type<tc>, window_params = [{transform_indices = @transform_0, window_bounds = array<i64: 1, 1, 16>}, {pipeline_mode = #tpu.pipeline_mode<synchronous>, transform_indices = @transform_1, window_bounds = array<i64: 1, 32>}, {pipeline_mode = #tpu.pipeline_mode<synchronous>, transform_indices = @transform_2, window_bounds = array<i64: 1, 32>}, {pipeline_mode = #tpu.pipeline_mode<synchronous>, transform_indices = @transform_3, window_bounds = array<i64: 16, 128>}, {pipeline_mode = #tpu.pipeline_mode<synchronous>, transform_indices = @transform_4, window_bounds = array<i64: 32, 128>}, {pipeline_mode = #tpu.pipeline_mode<synchronous>, transform_indices = @transform_5, window_bounds = array<i64: 1, 128>}, {pipeline_mode = #tpu.pipeline_mode<synchronous>, transform_indices = @transform_6, window_bounds = array<i64: 1, 32>}, {pipeline_mode = #tpu.pipeline_mode<synchronous>, transform_indices = @transform_7, window_bounds = array<i64: 1, 32>}]} {
    %c0_i32 = arith.constant 0 : i32
    %0 = arith.cmpi eq, %arg0, %c0_i32 : i32
    %1 = arith.extui %0 : i1 to i32
    %c0_i32_0 = arith.constant 0 : i32
    %2 = arith.cmpi ne, %1, %c0_i32_0 : i32
    scf.if %2 {
      %c0_23 = arith.constant 0 : index
      %c0_24 = arith.constant 0 : index
      %33 = vector.load %arg2[%c0_23, %c0_24] : memref<1x32xf32, #tpu.memory_space<vmem>>, vector<1x32xf32>
      %c0_25 = arith.constant 0 : index
      %c0_26 = arith.constant 0 : index
      %34 = vector.load %arg9[%c0_25, %c0_26] : memref<1x32xf32, #tpu.memory_space<vmem>>, vector<1x32xf32>
      tpu.vector_store %arg9[%c0_25, %c0_26], %33 {strides = array<i32>} : memref<1x32xf32, #tpu.memory_space<vmem>>, vector<1x32xf32>,
      %c0_27 = arith.constant 0 : index
      %c0_28 = arith.constant 0 : index
      %35 = vector.load %arg3[%c0_27, %c0_28] : memref<1x32xf32, #tpu.memory_space<vmem>>, vector<1x32xf32>
      %c0_29 = arith.constant 0 : index
      %c0_30 = arith.constant 0 : index
      %36 = vector.load %arg10[%c0_29, %c0_30] : memref<1x32xf32, #tpu.memory_space<vmem>>, vector<1x32xf32>
      tpu.vector_store %arg10[%c0_29, %c0_30], %35 {strides = array<i32>} : memref<1x32xf32, #tpu.memory_space<vmem>>, vector<1x32xf32>,
    } else {
    }
    %c0 = arith.constant 0 : index
    %c0_1 = arith.constant 0 : index
    %c0_2 = arith.constant 0 : index
    %3 = vector.load %arg1[%c0, %c0_1, %c0_2] : memref<1x1x16xf32, #tpu.memory_space<vmem>>, vector<1x1x16xf32>
    %4 = vector.shape_cast %3 : vector<1x1x16xf32> to vector<1x16xf32>
    %c0_3 = arith.constant 0 : index
    %c0_4 = arith.constant 0 : index
    %5 = vector.load %arg9[%c0_3, %c0_4] : memref<1x32xf32, #tpu.memory_space<vmem>>, vector<1x32xf32>
    %c0_5 = arith.constant 0 : index
    %c0_6 = arith.constant 0 : index
    %6 = vector.load %arg10[%c0_5, %c0_6] : memref<1x32xf32, #tpu.memory_space<vmem>>, vector<1x32xf32>
    %c0_7 = arith.constant 0 : index
    %c0_8 = arith.constant 0 : index
    %7 = vector.load %arg4[%c0_7, %c0_8] : memref<16x128xf32, #tpu.memory_space<vmem>>, vector<16x128xf32>
    %cst = arith.constant dense<0.000000e+00> : vector<1x128xf32>
    %8 = tpu.matmul %4, %7, %cst {dimension_numbers = #tpu.dot_dimension_numbers<[1], [0], [0], [1], [0, 0, 1, 1], [], []>} : vector<1x16xf32>, vector<16x128xf32>, vector<1x128xf32> -> vector<1x128xf32>
    %c0_9 = arith.constant 0 : index
    %c0_10 = arith.constant 0 : index
    %9 = vector.load %arg5[%c0_9, %c0_10] : memref<32x128xf32, #tpu.memory_space<vmem>>, vector<32x128xf32>
    %cst_11 = arith.constant dense<0.000000e+00> : vector<1x128xf32>
    %10 = tpu.matmul %5, %9, %cst_11 {dimension_numbers = #tpu.dot_dimension_numbers<[1], [0], [0], [1], [0, 0, 1, 1], [], []>} : vector<1x32xf32>, vector<32x128xf32>, vector<1x128xf32> -> vector<1x128xf32>
    %11 = arith.addf %8, %10 : vector<1x128xf32>
    %c0_12 = arith.constant 0 : index
    %c0_13 = arith.constant 0 : index
    %12 = vector.load %arg6[%c0_12, %c0_13] : memref<1x128xf32, #tpu.memory_space<vmem>>, vector<1x128xf32>
    %13 = arith.addf %11, %12 : vector<1x128xf32>
    %14 = arith.negf %13 : vector<1x128xf32>
    %15 = math.exp %14 : vector<1x128xf32>
    %cst_14 = arith.constant 1.000000e+00 : f32
    %16 = vector.broadcast %cst_14 : f32 to vector<1x128xf32>
    %17 = arith.addf %16, %15 : vector<1x128xf32>
    %18 = arith.divf %16, %17 : vector<1x128xf32>
    %19 = math.tanh %13 : vector<1x128xf32>
    %20 = vector.extract_strided_slice %18 {offsets = [0, 0], sizes = [1, 32], strides = [1, 1]} : vector<1x128xf32> to vector<1x32xf32>
    %21 = vector.extract_strided_slice %18 {offsets = [0, 32], sizes = [1, 32], strides = [1, 1]} : vector<1x128xf32> to vector<1x32xf32>
    %22 = vector.extract_strided_slice %19 {offsets = [0, 64], sizes = [1, 32], strides = [1, 1]} : vector<1x128xf32> to vector<1x32xf32>
    %23 = vector.extract_strided_slice %18 {offsets = [0, 96], sizes = [1, 32], strides = [1, 1]} : vector<1x128xf32> to vector<1x32xf32>
    %24 = arith.mulf %21, %6 : vector<1x32xf32>
    %25 = arith.mulf %20, %22 : vector<1x32xf32>
    %26 = arith.addf %24, %25 : vector<1x32xf32>
    %27 = math.tanh %26 : vector<1x32xf32>
    %28 = arith.mulf %23, %27 : vector<1x32xf32>
    %c0_15 = arith.constant 0 : index
    %c0_16 = arith.constant 0 : index
    %29 = vector.load %arg9[%c0_15, %c0_16] : memref<1x32xf32, #tpu.memory_space<vmem>>, vector<1x32xf32>
    tpu.vector_store %arg9[%c0_15, %c0_16], %28 {strides = array<i32>} : memref<1x32xf32, #tpu.memory_space<vmem>>, vector<1x32xf32>,
    %c0_17 = arith.constant 0 : index
    %c0_18 = arith.constant 0 : index
    %30 = vector.load %arg10[%c0_17, %c0_18] : memref<1x32xf32, #tpu.memory_space<vmem>>, vector<1x32xf32>
    tpu.vector_store %arg10[%c0_17, %c0_18], %26 {strides = array<i32>} : memref<1x32xf32, #tpu.memory_space<vmem>>, vector<1x32xf32>,
    %c0_19 = arith.constant 0 : index
    %c0_20 = arith.constant 0 : index
    %31 = vector.load %arg7[%c0_19, %c0_20] : memref<1x32xf32, #tpu.memory_space<vmem>>, vector<1x32xf32>
    tpu.vector_store %arg7[%c0_19, %c0_20], %28 {strides = array<i32>} : memref<1x32xf32, #tpu.memory_space<vmem>>, vector<1x32xf32>,
    %c0_21 = arith.constant 0 : index
    %c0_22 = arith.constant 0 : index
    %32 = vector.load %arg8[%c0_21, %c0_22] : memref<1x32xf32, #tpu.memory_space<vmem>>, vector<1x32xf32>
    tpu.vector_store %arg8[%c0_21, %c0_22], %26 {strides = array<i32>} : memref<1x32xf32, #tpu.memory_space<vmem>>, vector<1x32xf32>,
    return
  }
  func.func @transform_0(%arg0: i32) -> (i32, i32, i32) {
    %c0_i32 = arith.constant 0 : i32
    %c0_i32_0 = arith.constant 0 : i32
    %c0_i32_1 = arith.constant 0 : i32
    return %arg0, %c0_i32, %c0_i32_0 : i32, i32, i32
  }
  func.func @transform_1(%arg0: i32) -> (i32, i32) {
    %c0_i32 = arith.constant 0 : i32
    %c0_i32_0 = arith.constant 0 : i32
    %c0_i32_1 = arith.constant 0 : i32
    return %c0_i32, %c0_i32_0 : i32, i32
  }
  func.func @transform_2(%arg0: i32) -> (i32, i32) {
    %c0_i32 = arith.constant 0 : i32
    %c0_i32_0 = arith.constant 0 : i32
    %c0_i32_1 = arith.constant 0 : i32
    return %c0_i32, %c0_i32_0 : i32, i32
  }
  func.func @transform_3(%arg0: i32) -> (i32, i32) {
    %c0_i32 = arith.constant 0 : i32
    %c0_i32_0 = arith.constant 0 : i32
    %c0_i32_1 = arith.constant 0 : i32
    return %c0_i32, %c0_i32_0 : i32, i32
  }
  func.func @transform_4(%arg0: i32) -> (i32, i32) {
    %c0_i32 = arith.constant 0 : i32
    %c0_i32_0 = arith.constant 0 : i32
    %c0_i32_1 = arith.constant 0 : i32
    return %c0_i32, %c0_i32_0 : i32, i32
  }
  func.func @transform_5(%arg0: i32) -> (i32, i32) {
    %c0_i32 = arith.constant 0 : i32
    %c0_i32_0 = arith.constant 0 : i32
    %c0_i32_1 = arith.constant 0 : i32
    return %c0_i32, %c0_i32_0 : i32, i32
  }
  func.func @transform_6(%arg0: i32) -> (i32, i32) {
    %c0_i32 = arith.constant 0 : i32
    %c0_i32_0 = arith.constant 0 : i32
    %c0_i32_1 = arith.constant 0 : i32
    return %c0_i32, %c0_i32_0 : i32, i32
  }
  func.func @transform_7(%arg0: i32) -> (i32, i32) {
    %c0_i32 = arith.constant 0 : i32
    %c0_i32_0 = arith.constant 0 : i32
    %c0_i32_1 = arith.constant 0 : i32
    return %c0_i32, %c0_i32_0 : i32, i32
  }
}

</mosaic_0001>

<bundles_post_ra>
// kernel: tpu_custom_call.1
= control target key start
LH: loop header
LB: loop body
LE: loop exit
PB: predicated region body
PF: predicated region fallthrough
CT: control target
= control target key end

     0   :  { %13 = vsyncpa [#allocation5], 0  ;;  %s549_s0 = inlined_call_operand.hbm [shape: f32[1,1,16], index: 0, kind: input, shape index: {}]   ;;  %s550_s1 = inlined_call_operand.vmem [shape: f32[1,32], index: 1, kind: input, shape index: {}]   ;;  %s551_s2 = inlined_call_operand.vmem [shape: f32[1,32], index: 2, kind: input, shape index: {}]   ;;  %s552_s3 = inlined_call_operand.hbm [shape: f32[16,128], index: 3, kind: input, shape index: {}]   ;;  %s553_s4 = inlined_call_operand.hbm [shape: f32[32,128], index: 4, kind: input, shape index: {}]   ;;  %s554_s5 = inlined_call_operand.vmem [shape: f32[1,128], index: 5, kind: input, shape index: {}]   ;;  %s555_s6 = inlined_call_operand.hbm [shape: f32[1,32], index: 6, kind: output, shape index: {0}]   ;;  %s556_s7 = inlined_call_operand.hbm [shape: f32[1,32], index: 7, kind: output, shape index: {1}]  }
   0x1   :  { %14 = vsyncpa [#allocation8], 0 }
   0x2   :  { %15 = vsyncpa [#allocation6], 0 }
   0x3   :  { %16 = vsyncpa [#allocation12], 0  ;;  %s467_s24 = smov [#allocation7]  }
   0x4   :  { %s36_s25 = sshll.u32 %s467_s24, 4  ;;  %s37_s25 = int_to_ptr.vmem [resolvable:$true] %s36_s25 }
   0x5   :  { %s367_s26 = scalar_lea.vmem %s37_s25, 256  ;;  %p372_p1 = scmp.lt.s32.totalorder %s37_s25, %s37_s25 }
   0x6   :  { %p368_p0 = scmp.ne.s32.totalorder %s37_s25, %s367_s26  ;;  %p373_p2 = scmp.lt.s32.totalorder %s367_s26, %s367_s26 }
   0x8   :  { %p374_p3 = por %p373_p2, %p372_p1 }
   0xa   :  { %p375_p4 = pnand %p374_p3, %p368_p0 }
   0xc   :  { %378 = shalt.err (!%p375_p4)
}
   0xd   :  { %s468_s27 = smov 128   ;;  %s469_s28 = smov 8  }
   0xe   :  { %42 = dma.hbm_to_vmem [thread:$0]  %s552_s3, 256, %s37_s25, [#allocation8], %s468_s27, %s468_s27, %s469_s28  }
   0xf   :  { %s470_s8 = smov [#allocation4]   ;;  %s471_s10 = smov [#allocation9]  }
  0x10   :  { %s23_s9 = sshll.u32 %s470_s8, 4  ;;  %s48_s11 = sshll.u32 %s471_s10, 4  ;;  %s24_s9 = int_to_ptr.vmem [resolvable:$true] %s23_s9  ;;  %s49_s11 = int_to_ptr.vmem [resolvable:$true] %s48_s11 }
  0x11   :  { %s387_s12 = scalar_lea.vmem %s24_s9, 16  ;;  %s391_s13 = scalar_lea.vmem %s24_s9, 32 }
  0x12   :  { %p388_p5 = scmp.ne.s32.totalorder %s24_s9, %s387_s12  ;;  %p392_p6 = scmp.lt.s32.totalorder %s24_s9, %s24_s9 }
  0x13   :  { %p393_p7 = scmp.lt.s32.totalorder %s391_s13, %s387_s12 }
  0x15   :  { %p394_p8 = por %p393_p7, %p392_p6 }
  0x17   :  { %p395_p9 = pnand %p394_p8, %p388_p5 }
  0x19   :  { %398 = shalt.err (!%p395_p9)
}
  0x1a   :  { %26 = dma.hbm_to_vmem [thread:$0]  %s549_s0, 16, %s24_s9, [#allocation5]  }
  0x1b   :  { %s407_s16 = scalar_lea.vmem %s49_s11, 512  ;;  %p412_p11 = scmp.lt.s32.totalorder %s49_s11, %s49_s11 }
  0x1c   :  { %p408_p10 = scmp.ne.s32.totalorder %s49_s11, %s407_s16  ;;  %p413_p12 = scmp.lt.s32.totalorder %s407_s16, %s407_s16 }
  0x1e   :  { %p414_p13 = por %p413_p12, %p412_p11 }
  0x20   :  { %p415_p0 = pnand %p414_p13, %p408_p10 }
  0x22   :  { %418 = shalt.err (!%p415_p0)
}
  0x23   :  { %54 = dma.hbm_to_vmem [thread:$0]  %s553_s4, 512, %s49_s11, [#allocation8], %s468_s27, %s468_s27, %s469_s28  }
  0x24   :  { %459 = dma.done.wait [#allocation5], 16  }
  0x25   :  { %460 = vsyncadd [#allocation5], 4294967280 }
  0x26   :  { %461 = dma.done.wait [#allocation8], 768  }
  0x27   :  { %462 = vsyncadd [#allocation8], 4294966528  ;;  %v472_v0 = vmov 0.0   ;;  %vm473_vm0 = vmmov 0   ;;  %v83_v1 = vld [vmem:[#allocation9 + $0x18] sm:$0xff]  ;;  %v82_v2 = vld [vmem:[#allocation9 + $0x10] sm:$0xff] }
  0x28   :  { %321 = vmatprep.subr.mxu0 %v472_v0  ;;  %332 = vmatprep.subr.mxu1 %v472_v0  ;;  %v79_v3 = vld [vmem:[#allocation7 + $0x8] sm:$0xff]  ;;  %vm71_vm1 = vcmask 253952   ;;  %v78_v4 = vld [vmem:[#allocation7] sm:$0xff]  ;;  %v75_v5 = vld [vmem:[#allocation4] sm:$0x1]  ;;  %vm158_vm2 = vcmask 130048  }
  0x29   :  { %336 = vmatprep.mubr.msk.f32.mxu1 %vm473_vm0, %v472_v0  ;;  %329 = vmatprep.mubr.msk.f32.mxu0 %vm473_vm0, %v472_v0  ;;  %v81_v6 = vld [vmem:[#allocation9 + $0x8] sm:$0xff]  ;;  %v80_v8 = vld [vmem:[#allocation9] sm:$0xff]  ;;  %vm84_vm3 = vcmask 261120   ;;  %s474_s21 = smov 64   ;;  %s475_s22 = smov 32  }
  0x2a   :  { %322 = vmatpush3.msra.mxu0 %v83_v1  ;;  %333 = vmatpush3.msra.mxu1 %v79_v3  ;;  %v70_v7 = vld [vmem:[%s550_s1] sm:$0x1] }
  0x2b   :  { %323 = vmatprep.subr.mxu0 %v472_v0  ;;  %334 = vmatprep.subr.mxu1 %v472_v0  ;;  %72 = vst.msk [vmem:[#allocation2] sm:$0x1] %vm71_vm1, %v70_v7  ;;  %v73_v10 = vld [vmem:[%s551_s2] sm:$0x1]  ;;  %s476_s2 = smov 96  }
  0x2c   :  { %324 = vmatpush3.msra.mxu0 %v82_v2  ;;  %335 = vmatpush3.msra.mxu1 %v78_v4  ;;  %74 = vst.msk [vmem:[#allocation3] sm:$0x1] %vm71_vm1, %v73_v10  ;;  %v232_v14 = vld [vmem:[%s554_s5] sm:$0x1]  ;;  %s477_s5 = smov [#allocation11]  }
  0x2d   :  { %325 = vmatprep.subr.mxu0 %v472_v0  ;;  %337 = vmatmul.mubr.msk.f32.vlgmr.msra.gmra.mxu1 %vm158_vm2, %v75_v5  ;;  %s295_s23 = sshll.u32 %s477_s5, 4  ;;  %s296_s23 = int_to_ptr.vmem [resolvable:$true] %s295_s23 }
  0x2e   :  { %326 = vmatpush3.msra.mxu0 %v81_v6  ;;  %s419_s24 = scalar_lea.vmem %s296_s23, 16  ;;  %s423_s25 = scalar_lea.vmem %s296_s23, 32 }
  0x2f   :  { %327 = vmatprep.subr.mxu0 %v472_v0  ;;  %p420_p1 = scmp.ne.s32.totalorder %s296_s23, %s419_s24  ;;  %p424_p2 = scmp.lt.s32.totalorder %s296_s23, %s296_s23 }
  0x30   :  { %328 = vmatpush3.msra.mxu0 %v80_v8  ;;  %p425_p3 = scmp.lt.s32.totalorder %s423_s25, %s419_s24 }
  0x32   :  { %v76_v9 = vld [vmem:[#allocation2] sm:$0x1]  ;;  %p426_p4 = por %p425_p3, %p424_p2 }
  0x33   :  { %330 = vmatmul.mubr.msk.f32.vlgmr.msra.gmra.mxu0 %vm84_vm3, %v76_v9  ;;  %v312_v19 = vld [vmem:[#allocation3] ss:$0 sm:$0xff] }
  0x34   :  { %p427_p5 = pnand %p426_p4, %p420_p1 }
  0xed   :  { %v228_v11 = vpop.f32.mrf.mxu1 }
  0xef   :  { %v338_v12 = vpop.f32.mrf.mxu1 }
  0xf3   :  { %v154_v13 = vpop.f32.mrf.mxu0 }
  0xf4   :  { %v229_v15 = vadd.f32 %v228_v11, %v154_v13 }
  0xf5   :  { %v331_v16 = vpop.f32.mrf.mxu0 }
  0xf6   :  { %v233_v17 = vadd.f32 %v232_v14, %v229_v15 }
  0xf8   :  { %351 = vtanh.f32 %v233_v17  ;;  %v311_v20 = vmul.f32 -1.442695, %v233_v17 }
  0xfa   :  { %353 = vpow2.f32 %v311_v20 }
 0x105   :  { %v352_v18 = vpop.eup %351 }
 0x106   :  { %251 = vrot.lane.b32.xlu0 %v352_v18, %s474_s21 }
 0x107   :  { %v354_v21 = vpop.eup %353 }
 0x108   :  { %v237_v22 = vadd.f32 1.0, %v354_v21 }
 0x10a   :  { %246 = vrot.lane.b32.xlu0 %v312_v19, %s475_s22  ;;  %355 = vrcp.f32 %v237_v22 }
 0x117   :  { %v356_v23 = vpop.eup %355 }
 0x178   :  { %v252_v24 = vpop.permute.xlu0 %251 }
 0x179   :  { %v254_v25 = vmul.f32 %v356_v23, %v252_v24 }
 0x17b   :  { %256 = vrot.lane.b32.xlu1 %v254_v25, %s475_s22 }
 0x17c   :  { %v247_v26 = vpop.permute.xlu0 %246 }
 0x17d   :  { %v249_v27 = vmul.f32 %v356_v23, %v247_v26 }
 0x1ed   :  { %v257_v28 = vpop.permute.xlu1 %256 }
 0x1ee   :  { %v259_v29 = vadd.f32 %v257_v28, %v249_v27 }
 0x1f0   :  { %357 = vtanh.f32 %v259_v29 }
 0x1fd   :  { %v358_v30 = vpop.eup %357 }
 0x1fe   :  { %262 = vrot.lane.b32.xlu1 %v358_v30, %s474_s21 }
 0x202   :  { %273 = vrot.lane.b32.xlu1 %v259_v29, %s476_s2 }
 0x270   :  { %v263_v31 = vpop.permute.xlu1 %262 }
 0x271   :  { %v265_v32 = vmul.f32 %v356_v23, %v263_v31 }
 0x273   :  { %267 = vrot.lane.b32.xlu0 %v265_v32, %s475_s22 }
 0x274   :  { %v274_v33 = vpop.permute.xlu1 %273 }
 0x275   :  { %276 = vst.msk [vmem:[#allocation3] sm:$0x1] %vm71_vm1, %v274_v33  ;;  %278 = vst.msk [vmem:[#allocation11] sm:$0x1] %vm71_vm1, %v274_v33 }
 0x276   :  { %430 = shalt.err (!%p427_p5)
}
 0x277   :  { %298 = dma.vmem_to_hbm [thread:$0]  %s296_s23, 16, %s556_s7, [#allocation12]  }
 0x278   :  { %s478_s28 = smov [#allocation10]  }
 0x279   :  { %s285_s29 = sshll.u32 %s478_s28, 4  ;;  %s286_s29 = int_to_ptr.vmem [resolvable:$true] %s285_s29 }
 0x27a   :  { %s439_s30 = scalar_lea.vmem %s286_s29, 16  ;;  %s443_s8 = scalar_lea.vmem %s286_s29, 32 }
 0x27b   :  { %p440_p6 = scmp.ne.s32.totalorder %s286_s29, %s439_s30  ;;  %p444_p7 = scmp.lt.s32.totalorder %s286_s29, %s286_s29 }
 0x27c   :  { %p445_p8 = scmp.lt.s32.totalorder %s443_s8, %s439_s30 }
 0x27e   :  { %p446_p9 = por %p445_p8, %p444_p7 }
 0x280   :  { %p447_p10 = pnand %p446_p9, %p440_p6 }
 0x2e5   :  { %v268_v34 = vpop.permute.xlu0 %267 }
 0x2e6   :  { %271 = vst.msk [vmem:[#allocation2] sm:$0x1] %vm71_vm1, %v268_v34  ;;  %277 = vst.msk [vmem:[#allocation10] sm:$0x1] %vm71_vm1, %v268_v34 }
 0x2e7   :  { %450 = shalt.err (!%p447_p10)
}
 0x2e8   :  { %288 = dma.vmem_to_hbm [thread:$0]  %s286_s29, 16, %s555_s6, [#allocation6]  }
 0x2e9   :  { %463 = dma.done.wait [#allocation6], 16  }
 0x2ea   :  { %464 = vsyncadd [#allocation6], 4294967280 }
 0x2eb   :  { %465 = dma.done.wait [#allocation12], 16  }
 0x2ec   :  { %466 = vsyncadd [#allocation12], 4294967280 }
 0x2ed   :  { %305 = vsyncpa [#allocation5], 1 }
 0x2ee   :  { %306 = vsyncpa [#allocation8], 1 }
 0x2ef   :  { %307 = vsyncpa [#allocation6], 1 }
 0x2f0   :  { %308 = vsyncpa [#allocation12], 1 }

</bundles_post_ra>
